<compile_context>
chip_gen: v6e
topology: v6e:2x2x1
jax: 0.10.0
libtpu: 0.0.40
codegen_flags: <defaults>
</compile_context>

<pallas_src>
import jax
import jax.numpy as jnp
from jax import lax
from jax.experimental import pallas as pl
from jax.experimental.pallas import tpu as pltpu


# ----------------------------- Pallas kernel --------------------------------

def _sim_kernel(src_ref, trg_ref, inv_s_ref, inv_t_ref, out_ref):
    # src_ref:   (TM, C)   bf16 tile of source features (C on the lane axis)
    # trg_ref:   (C, TN)   bf16 tile of target features (L on the lane axis)
    # inv_s_ref: (TM, 1)   f32 1/max(||src_row||, eps)
    # inv_t_ref: (1, TN)   f32 1/max(||trg_col||, eps)
    # out_ref:   (TM, TN)  relu(cosine similarity)
    #
    # Raw bf16 MXU matmul with f32 accumulation; trg consumed channel-major —
    # no transpose, no in-kernel reductions (norms are precomputed).
    acc = jnp.dot(src_ref[...], trg_ref[...], preferred_element_type=jnp.float32)
    scaled = acc * inv_s_ref[...] * inv_t_ref[...]
    out_ref[...] = jnp.maximum(scaled, 0.0).astype(out_ref.dtype)


def _pick_tiles(Lp, C, out_sz, budget_bytes):
    """Largest lane-dense (tm, tn) dividing Lp whose double-buffered footprint
    (src + trg + inv_s + inv_t + out, x2 buffers) fits the VMEM budget."""
    def footprint(tm, tn):
        per = tm * C * 2 + C * tn * 2 + tm * 4 + tn * 4 + tm * tn * out_sz
        return 2 * per  # double-buffered

    for tn in (1024, 512, 256, 128):
        if Lp % tn:
            continue
        for tm in (512, 256, 128):
            if Lp % tm:
                continue
            if footprint(tm, tn) <= budget_bytes:
                return tm, tn
    return 128, 128  # Lp is always a multiple of 128 by construction


def dense_match_sim(src_cl, trg_cl, *, out_dtype=jnp.float32, tm=None, tn=None,
                    vmem_budget_bytes=12 * 1024 * 1024):
    """src_cl, trg_cl: (B, C, L) float features (channel-major, as produced by
    reshape(B, C, H*W)).  Returns relu(cosine-sim) of shape (B, L, L)."""
    B, C, L = src_cl.shape
    assert trg_cl.shape == (B, C, L), trg_cl.shape

    # --- hoisted L2-norm scales (f32, computed once; O(B*L*C)) --------------
    #   rsqrt(max(sum(x^2), eps^2)) == 1 / max(||x||, eps)   (torch eps=1e-12)
    eps2 = 1e-24  # (1e-12)^2 — representable (normal) in f32
    s32 = src_cl.astype(jnp.float32)
    t32 = trg_cl.astype(jnp.float32)
    inv_s = lax.rsqrt(jnp.maximum(jnp.sum(s32 * s32, axis=1), eps2))[:, :, None]  # (B,L,1)
    inv_t = lax.rsqrt(jnp.maximum(jnp.sum(t32 * t32, axis=1), eps2))[:, None, :]  # (B,1,L)

    # --- bf16 MXU inputs; cast-then-transpose for src (single HBM pass) -----
    src_lc = src_cl.astype(jnp.bfloat16).transpose(0, 2, 1)  # (B, L, C)
    trg_bf = trg_cl.astype(jnp.bfloat16)                     # (B, C, L) — no transpose

    # --- pad L up to a multiple of 128 so output tiles stay lane-dense ------
    Lp = ((L + 127) // 128) * 128
    if Lp != L:
        pad = Lp - L
        src_lc = jnp.pad(src_lc, ((0, 0), (0, pad), (0, 0)))
        trg_bf = jnp.pad(trg_bf, ((0, 0), (0, 0), (0, pad)))
        inv_s = jnp.pad(inv_s, ((0, 0), (0, pad), (0, 0)))
        inv_t = jnp.pad(inv_t, ((0, 0), (0, 0), (0, pad)))

    out_sz = jnp.dtype(out_dtype).itemsize
    if tm is None or tn is None:
        atm, atn = _pick_tiles(Lp, C, out_sz, vmem_budget_bytes)
        tm = tm or atm
        tn = tn or atn
    gm, gn = Lp // tm, Lp // tn

    cost = pl.CostEstimate(
        flops=int(2 * B * Lp * Lp * C),
        transcendentals=0,
        bytes_accessed=int(B * Lp * Lp * out_sz            # output write
                           + B * Lp * C * 2 * (gm + gn)    # src/trg re-reads
                           + 2 * B * Lp * 4),              # inv_s / inv_t
    )

    sim = pl.pallas_call(
        _sim_kernel,
        out_shape=jax.ShapeDtypeStruct((B, Lp, Lp), out_dtype),
        grid_spec=pl.GridSpec(
            grid=(B, gm, gn),
            in_specs=[
                # src: (TM, C) tile, batch dim squeezed out
                pl.BlockSpec((pl.Squeezed(), tm, C), lambda b, i, j: (b, i, 0)),
                # trg: (C, TN) tile — channel-major, no transpose anywhere
                pl.BlockSpec((pl.Squeezed(), C, tn), lambda b, i, j: (b, 0, j)),
                # precomputed inverse norms (tiny)
                pl.BlockSpec((pl.Squeezed(), tm, 1), lambda b, i, j: (b, i, 0)),
                pl.BlockSpec((pl.Squeezed(), 1, tn), lambda b, i, j: (b, 0, j)),
            ],
            out_specs=pl.BlockSpec((pl.Squeezed(), tm, tn),
                                   lambda b, i, j: (b, i, j)),
        ),
        compiler_params=pltpu.CompilerParams(
            dimension_semantics=("parallel", "parallel", "parallel")),
        cost_estimate=cost,
    )(src_lc, trg_bf, inv_s, inv_t)

    if Lp != L:
        sim = sim[:, :L, :L]
    return sim


# ------------------------------ JAX glue -------------------------------------

def bilinear_align_corners(x, out_h, out_w):
    """F.interpolate(..., mode='bilinear', align_corners=True) for NCHW."""
    _, _, H, W = x.shape

    def interp_matrix(in_size, out_size):
        if out_size == 1 or in_size == 1:
            pos = jnp.zeros((out_size,), jnp.float32)
        else:
            pos = jnp.arange(out_size, dtype=jnp.float32) * (
                (in_size - 1) / (out_size - 1))
        lo = jnp.floor(pos).astype(jnp.int32)
        hi = jnp.minimum(lo + 1, in_size - 1)
        frac = pos - lo.astype(jnp.float32)
        M = jnp.zeros((out_size, in_size), jnp.float32)
        M = M.at[jnp.arange(out_size), lo].add(1.0 - frac)
        M = M.at[jnp.arange(out_size), hi].add(frac)
        return M

    Mh = interp_matrix(H, out_h)            # (out_h, H)
    Mw = interp_matrix(W, out_w)            # (out_w, W)
    y = jnp.einsum('oh,bchw->bcow', Mh, x.astype(jnp.float32))
    y = jnp.einsum('pw,bcow->bcop', Mw, y)
    return y


def init_params(key):
    # Deterministic stand-in backbone weights (see TODO below).
    k1, k2 = jax.random.split(key)
    return {
        "w_stem": jax.random.normal(k1, (64, 3, 7, 7), jnp.float32) * 0.1,
        "w_l1": jax.random.normal(k2, (64, 64, 3, 3), jnp.float32) * 0.1,
    }


def extract_feats(img, params):
    # TODO(synk): pretrained ResNet-50/101 backbone cannot be reproduced
    # without a checkpoint; replaced with a deterministic conv stem producing
    # two multi-scale feature maps (same downstream semantics as self.layers
    # with two entries, concat channels = 128).
    dn = ("NCHW", "OIHW", "NCHW")
    x = lax.conv_general_dilated(img, params["w_stem"], (2, 2), "SAME",
                                 dimension_numbers=dn)
    x = jnp.maximum(x, 0.0)
    x = lax.reduce_window(x, -jnp.inf, lax.max,
                          (1, 1, 3, 3), (1, 1, 2, 2), "SAME")
    f0 = x                                        # "layer 0" feature
    y = lax.conv_general_dilated(x, params["w_l1"], (2, 2), "SAME",
                                 dimension_numbers=dn)
    y = jnp.maximum(y, 0.0)
    f1 = y                                        # deeper feature (coarser)
    return [f0, f1]


def forward(imgs, params):
    """Mirrors Model.forward with neck=None, corr_projector=None,
    match_layers=[], return_mask=False -> returns (None, None, sim)."""
    b = imgs.shape[0]
    feats = extract_feats(imgs, params)
    src_f = [f[: b // 2] for f in feats]
    trg_f = [f[b // 2:] for f in feats]

    base_h, base_w = feats[0].shape[2], feats[0].shape[3]
    src_feat = [bilinear_align_corners(f, base_h, base_w) for f in src_f]
    trg_feat = [bilinear_align_corners(f, base_h, base_w) for f in trg_f]

    # neck is None -> concat along channel dim
    src_feat = jnp.concatenate(src_feat, axis=1)   # (B/2, Ctot, H, W)
    trg_feat = jnp.concatenate(trg_feat, axis=1)

    B2, C, H, W = src_feat.shape
    # Both kept channel-major; dense_match_sim handles the (cheap) bf16
    # cast-then-transpose of src internally and consumes trg untransposed.
    src_cl = src_feat.reshape(B2, C, H * W)
    trg_cl = trg_feat.reshape(B2, C, H * W)

    sim = dense_match_sim(src_cl, trg_cl)          # (B/2, HW, HW) f32

    match_src_feat, match_trg_feat = None, None    # loss.match_layers == []
    return match_src_feat, match_trg_feat, sim


def _sim_reference(src_lc, trg_lc):
    eps = 1e-12
    s = src_lc / jnp.maximum(
        jnp.linalg.norm(src_lc, axis=-1, keepdims=True), eps)
    t = trg_lc / jnp.maximum(
        jnp.linalg.norm(trg_lc, axis=-1, keepdims=True), eps)
    return jnp.maximum(jnp.einsum('blc,bLc->blL', s, t), 0.0)


# -------------------------------- main ---------------------------------------

if __name__ == "__main__":
    key = jax.random.PRNGKey(0)
    pkey, xkey = jax.random.split(key)
    params = init_params(pkey)

    # batch=4 (2 src + 2 trg), 3x64x64 images -> base feat 16x16 (L=256), C=128
    imgs = jax.random.normal(xkey, (4, 3, 64, 64), jnp.float32)

    match_src, match_trg, sim = forward(imgs, params)
    sim = jax.block_until_ready(sim)

    # sanity: (B//2, HW, HW)
    assert sim.shape == (2, 256, 256), sim.shape

    # correctness of the Pallas hot path vs a pure-JAX f32 reference
    feats = extract_feats(imgs, params)
    bh, bw = feats[0].shape[2], feats[0].shape[3]
    src_cat = jnp.concatenate(
        [bilinear_align_corners(f[:2], bh, bw) for f in feats], axis=1)
    trg_cat = jnp.concatenate(
        [bilinear_align_corners(f[2:], bh, bw) for f in feats], axis=1)
    B2, C, H, W = src_cat.shape
    src_lc = src_cat.reshape(B2, C, H * W).transpose(0, 2, 1)
    trg_lc = trg_cat.reshape(B2, C, H * W).transpose(0, 2, 1)
    ref = _sim_reference(src_lc, trg_lc)
    assert jnp.allclose(sim, ref, atol=2e-2, rtol=2e-2), "mismatch vs reference"

    print("KERNEL_OK")
</pallas_src>

<mosaic_0001>
module attributes {stable_mosaic.version = 11 : i64} {
  func.func @_sim_kernel(%arg0: i32, %arg1: i32, %arg2: i32, %arg3: memref<1x256x128xbf16, #tpu.memory_space<vmem>>, %arg4: memref<1x128x256xbf16, #tpu.memory_space<vmem>>, %arg5: memref<1x256x1xf32, #tpu.memory_space<vmem>>, %arg6: memref<1x1x256xf32, #tpu.memory_space<vmem>>, %arg7: memref<1x256x256xf32, #tpu.memory_space<vmem>>) attributes {dimension_semantics = [#tpu.dimension_semantics<parallel>, #tpu.dimension_semantics<parallel>, #tpu.dimension_semantics<parallel>], iteration_bounds = array<i64: 2, 1, 1>, scalar_prefetch = 0 : i64, scratch_operands = 0 : i64, tpu.core_type = #tpu.core_type<tc>, window_params = [{transform_indices = @transform_0, window_bounds = array<i64: 1, 256, 128>}, {transform_indices = @transform_1, window_bounds = array<i64: 1, 128, 256>}, {transform_indices = @transform_2, window_bounds = array<i64: 1, 256, 1>}, {transform_indices = @transform_3, window_bounds = array<i64: 1, 1, 256>}, {transform_indices = @transform_4, window_bounds = array<i64: 1, 256, 256>}]} {
    %c0 = arith.constant 0 : index
    %c0_0 = arith.constant 0 : index
    %c0_1 = arith.constant 0 : index
    %0 = vector.load %arg3[%c0, %c0_0, %c0_1] : memref<1x256x128xbf16, #tpu.memory_space<vmem>>, vector<1x256x128xbf16>
    %1 = vector.shape_cast %0 : vector<1x256x128xbf16> to vector<256x128xbf16>
    %c0_2 = arith.constant 0 : index
    %c0_3 = arith.constant 0 : index
    %c0_4 = arith.constant 0 : index
    %2 = vector.load %arg4[%c0_2, %c0_3, %c0_4] : memref<1x128x256xbf16, #tpu.memory_space<vmem>>, vector<1x128x256xbf16>
    %3 = vector.shape_cast %2 : vector<1x128x256xbf16> to vector<128x256xbf16>
    %cst = arith.constant dense<0.000000e+00> : vector<256x256xf32>
    %4 = tpu.matmul %1, %3, %cst {dimension_numbers = #tpu.dot_dimension_numbers<[1], [0], [0], [1], [0, 0, 1, 1], [], []>} : vector<256x128xbf16>, vector<128x256xbf16>, vector<256x256xf32> -> vector<256x256xf32>
    %c0_5 = arith.constant 0 : index
    %c0_6 = arith.constant 0 : index
    %c0_7 = arith.constant 0 : index
    %5 = vector.load %arg5[%c0_5, %c0_6, %c0_7] : memref<1x256x1xf32, #tpu.memory_space<vmem>>, vector<1x256x1xf32>
    %6 = vector.shape_cast %5 : vector<1x256x1xf32> to vector<256x1xf32>
    %7 = vector.broadcast %6 : vector<256x1xf32> to vector<256x256xf32>
    %8 = arith.mulf %4, %7 : vector<256x256xf32>
    %c0_8 = arith.constant 0 : index
    %c0_9 = arith.constant 0 : index
    %c0_10 = arith.constant 0 : index
    %9 = vector.load %arg6[%c0_8, %c0_9, %c0_10] : memref<1x1x256xf32, #tpu.memory_space<vmem>>, vector<1x1x256xf32>
    %10 = vector.shape_cast %9 : vector<1x1x256xf32> to vector<1x256xf32>
    %11 = vector.broadcast %10 : vector<1x256xf32> to vector<256x256xf32>
    %12 = arith.mulf %8, %11 : vector<256x256xf32>
    %cst_11 = arith.constant 0.000000e+00 : f32
    %13 = vector.broadcast %cst_11 : f32 to vector<256x256xf32>
    %14 = arith.maximumf %12, %13 : vector<256x256xf32>
    %c0_12 = arith.constant 0 : index
    %c0_13 = arith.constant 0 : index
    %c0_14 = arith.constant 0 : index
    %15 = vector.load %arg7[%c0_12, %c0_13, %c0_14] : memref<1x256x256xf32, #tpu.memory_space<vmem>>, vector<1x256x256xf32>
    %16 = vector.shape_cast %15 : vector<1x256x256xf32> to vector<256x256xf32>
    %17 = vector.shape_cast %14 : vector<256x256xf32> to vector<1x256x256xf32>
    tpu.vector_store %arg7[%c0_12, %c0_13, %c0_14], %17 {strides = array<i32>} : memref<1x256x256xf32, #tpu.memory_space<vmem>>, vector<1x256x256xf32>,
    return
  }
  func.func @transform_0(%arg0: i32, %arg1: i32, %arg2: i32) -> (i32, i32, i32) {
    %c0_i32 = arith.constant 0 : i32
    %c0_i32_0 = arith.constant 0 : i32
    return %arg0, %arg1, %c0_i32 : i32, i32, i32
  }
  func.func @transform_1(%arg0: i32, %arg1: i32, %arg2: i32) -> (i32, i32, i32) {
    %c0_i32 = arith.constant 0 : i32
    %c0_i32_0 = arith.constant 0 : i32
    return %arg0, %c0_i32, %arg2 : i32, i32, i32
  }
  func.func @transform_2(%arg0: i32, %arg1: i32, %arg2: i32) -> (i32, i32, i32) {
    %c0_i32 = arith.constant 0 : i32
    %c0_i32_0 = arith.constant 0 : i32
    return %arg0, %arg1, %c0_i32 : i32, i32, i32
  }
  func.func @transform_3(%arg0: i32, %arg1: i32, %arg2: i32) -> (i32, i32, i32) {
    %c0_i32 = arith.constant 0 : i32
    %c0_i32_0 = arith.constant 0 : i32
    return %arg0, %c0_i32, %arg2 : i32, i32, i32
  }
  func.func @transform_4(%arg0: i32, %arg1: i32, %arg2: i32) -> (i32, i32, i32) {
    %c0_i32 = arith.constant 0 : i32
    return %arg0, %arg1, %arg2 : i32, i32, i32
  }
}

</mosaic_0001>

<bundles_post_ra>
// kernel: tpu_custom_call.1
= control target key start
LH: loop header
LB: loop body
LE: loop exit
PB: predicated region body
PF: predicated region fallthrough
CT: control target
= control target key end

     0   :  { %9 = vsyncpa [#allocation3], 0  ;;  %s2062_s0 = inlined_call_operand.vmem [shape: bf16[2,256,128], index: 0, kind: input, shape index: {}]   ;;  %s2063_s1 = inlined_call_operand.vmem [shape: bf16[2,128,256], index: 1, kind: input, shape index: {}]   ;;  %s2064_s2 = inlined_call_operand.vmem [shape: f32[2,256,1], index: 2, kind: input, shape index: {}]   ;;  %s2065_s3 = inlined_call_operand.vmem [shape: f32[2,1,256], index: 3, kind: input, shape index: {}]   ;;  %s2066_s4 = inlined_call_operand.hbm [shape: f32[2,256,256], index: 4, kind: output, shape index: {}]  }
   0x1   :  { %11 = vsyncpa [#allocation3 + $0x1], 0  ;;  %s1651_s15 = smov 0   ;;  %s1653_s16 = smov 0  }
   0x2   :  { %s1655_s17 = smov 0   ;;  %s1657_s18 = smov 0  }
   0x3   :  { %s1659_s19 = smov 0   ;;  %s1661_s20 = smov 0  }
   0x4 LB: > { %s1374_s21 = sadd.s32 4294967295, %s1620_s20   ;;  %s1375_s22 = sadd.s32 4294967294, %s1620_s20   ;;  %s1620_s20 = sphi %s1661_s20, %s17_s20   ;;  %s1616_s19 = sphi %s1659_s19, %s2073_s19   ;;  %s1612_s18 = sphi %s1657_s18, %s2072_s18   ;;  %s1608_s17 = sphi %s1655_s17, %s2071_s17   ;;  %s1604_s16 = sphi %s1653_s16, %s2070_s16   ;;  %s1600_s15 = sphi %s1651_s15, %s2069_s15  }
   0x5   : > { %s36_s23 = sadd.s32 1, %s1616_s19  ;;  %s159_s24 = sadd.s32 1, %s1608_s17 }
   0x6   : > { %p38_p0 = scmp.ge.s32.totalorder %s36_s23, 2  ;;  %p169_p1 = scmp.ne.s32.totalorder %s1608_s17, %s1604_s16 }
   0x7   : > { %p170_p2 = scmp.eq.s32.totalorder %s1374_s21, 1  ;;  %p175_p3 = scmp.ne.s32.totalorder %s1604_s16, %s1600_s15 }
   0x8   : > { %s2075_s23 = smov (%p38_p0, %s36_s23), 0  ;;  %p176_p5 = scmp.eq.s32.totalorder %s1375_s22, 1 }
   0x9   : > { %p1691_p4 = por %p170_p2, %p169_p1  ;;  %s152_s26 = ssub.s32 %s1616_s19, %s2075_s23 }
   0xa   : > { %p1378_p6 = scmp.ge.s32.totalorder %s1620_s20, 1  ;;  %p157_p7 = scmp.eq.s32.totalorder %s152_s26, 0 }
   0xb   : > { %p1698_p8 = por %p176_p5, %p175_p3  ;;  %p245_p9 = scmp.lt.s32.totalorder %s1620_s20, 3 }
   0xc   : > { %s1704_s28 = scalar_select %p157_p7, %s1608_s17, %s159_s24  }
   0xd   : > { %p246_p10 = pnand %p1378_p6, %p245_p9 }
   0xe   : > { %p302_p11 = scmp.lt.s32.totalorder (!%p246_p10), %s1612_s18, 1  ;;  %s1427_s6 = sshll.u32 (!%p246_p10), %s1612_s18, 13 }
   0xf   : > { %249 = sbr.rel (%p246_p10) target bundleno = 332 (0x14c), region = 36  ;;  %s2007_s10 = scalar_lea.hbm (!%p246_p10), %s2066_s4, %s1427_s6 }
  0x10   : > { %s1623_s12 = smov (!%p246_p10), [#allocation2]  }
  0x11   : > { %s1548_s13 = sshll.u32 (!%p246_p10), %s1623_s12, 4  ;;  %s1549_s13 = int_to_ptr.vmem [resolvable:$false] %s1548_s13 }
  0x14   : > { %v1622_v0 = vmov 0   ;;  %s1710_s29 = scalar_select %p302_p11, %s1612_s18, 1 }
  0x15   : > { %599 = vmatprep.mubr.bf16.mxu0 %v1622_v0  ;;  %679 = vmatprep.mubr.bf16.mxu1 %v1622_v0 }
  0x16   : > { %1503 = vset.pattern.permute.xlu1 %v1622_v0  ;;  %1502 = vset.pattern.permute.xlu0 %v1622_v0  ;;  %s1424_s30 = sshll.u32 %s1710_s29, 7  ;;  %s1426_s8 = sshll.u32 %s1710_s29, 8 }
  0x17   : > { %s1718_s7 = scalar_lea.vmem %s2063_s1, %s1424_s30  ;;  %s1731_s11 = scalar_lea.vmem %s2062_s0, %s1424_s30 }
  0x18   : > { %v1504_v1 = vld [vmem:[%s1718_s7 + $0x74] ss:$8 sps:$4 sm:$0xff]   ;;  %v1506_v2 = vld [vmem:[%s1718_s7 + $0x70] ss:$8 sps:$4 sm:$0xff]   ;;  %v1507_v3 = vld [vmem:[%s1718_s7 + $0x64] ss:$8 sps:$4 sm:$0xff]   ;;  %s1737_s14 = scalar_lea.vmem %s2064_s2, %s1426_s8 }
  0x19   : > { %567 = vmatprep.subr.bf16.mxu0 %v1504_v1  ;;  %1428 = vmatprep.subr.bf16.mxu1 %v1504_v1  ;;  %v1509_v4 = vld [vmem:[%s1718_s7 + $0x60] ss:$8 sps:$4 sm:$0xff]   ;;  %v1510_v5 = vld [vmem:[%s1718_s7 + $0x54] ss:$8 sps:$4 sm:$0xff]   ;;  %v1512_v6 = vld [vmem:[%s1718_s7 + $0x50] ss:$8 sps:$4 sm:$0xff]  }
  0x1a   : > { %568 = vmatpush1.bf16.msra.mxu0 %v1506_v2  ;;  %1436 = vmatpush1.bf16.msra.mxu1 %v1506_v2  ;;  %v1513_v7 = vld [vmem:[%s1718_s7 + $0x44] ss:$8 sps:$4 sm:$0xff]   ;;  %v1515_v8 = vld [vmem:[%s1718_s7 + $0x40] ss:$8 sps:$4 sm:$0xff]   ;;  %v1516_v9 = vld [vmem:[%s1718_s7 + $0x34] ss:$8 sps:$4 sm:$0xff]  }
  0x1b   : > { %569 = vmatprep.subr.bf16.mxu0 %v1507_v3  ;;  %1429 = vmatprep.subr.bf16.mxu1 %v1507_v3  ;;  %v1518_v10 = vld [vmem:[%s1718_s7 + $0x30] ss:$8 sps:$4 sm:$0xff]   ;;  %v760_v12 = vld [vmem:[%s1737_s14] sm:$0xff]  ;;  %v761_v15 = vld [vmem:[%s1737_s14 + $0x8] sm:$0xff]  ;;  %s1386_s21 = sshll.u32 %s1710_s29, 1  ;;  %s298_s30 = sand.u32 1, %s1604_s16  }
  0x1c   : > { %v762_v11 = vld [vmem:[%s1737_s14 + $0x10] sm:$0xff]  ;;  %v1519_v13 = vld [vmem:[%s1718_s7 + $0x24] ss:$8 sps:$4 sm:$0xff]   ;;  %794 = vperm.xlu0 %1502, %v760_v12   ;;  %v763_v14 = vld [vmem:[%s1737_s14 + $0x18] sm:$0xff]  ;;  %v1018_v12 = vlaneseq  ;;  %s338_s26 = scalar_lea.vmem %s2065_s3, %s1386_s21  ;;  %s1379_s29 = sshll.u32 %s298_s30, 9 }
  0x1d   : > { %804 = vperm.xlu1 %1503, %v762_v11   ;;  %v1521_v16 = vld [vmem:[%s1718_s7 + $0x20] ss:$8 sps:$4 sm:$0xff]   ;;  %v1522_v17 = vld [vmem:[%s1718_s7 + $0x14] ss:$8 sps:$4 sm:$0xff]   ;;  %v1524_v20 = vld [vmem:[%s1718_s7 + $0x10] ss:$8 sps:$4 sm:$0xff]  }
  0x1e   : > { %570 = vmatpush1.bf16.msra.mxu0 %v1509_v4  ;;  %1437 = vmatpush1.bf16.msra.mxu1 %v1509_v4  ;;  %v765_v18 = vld [vmem:[%s1737_s14 + $0x28] sm:$0xff]  ;;  %v764_v19 = vld [vmem:[%s1737_s14 + $0x20] sm:$0xff]  ;;  %v767_v22 = vld [vmem:[%s1737_s14 + $0x38] sm:$0xff]  ;;  %s1852_s5 = scalar_lea.vmem [#allocation2], %s1379_s29  ;;  %s2017_s18 = scalar_lea.sflag [#allocation3], %s298_s30 }
  0x1f   : > { %571 = vmatprep.subr.bf16.mxu0 %v1510_v5  ;;  %1430 = vmatprep.subr.bf16.mxu1 %v1510_v5  ;;  %v1525_v21 = vld [vmem:[%s1718_s7 + $0x4] ss:$8 sps:$4 sm:$0xff]   ;;  %v766_v23 = vld [vmem:[%s1737_s14 + $0x30] sm:$0xff]  ;;  %v1527_v24 = vld [vmem:[%s1718_s7] ss:$8 sps:$4 sm:$0xff]   ;;  %s1239_s7 = sshll.u32 %s1852_s5, 4  ;;  %s2009_s7 = int_to_ptr.vmem [resolvable:$true] %s1239_s7 }
  0x20   : > { %799 = vperm.xlu0 %1502, %v761_v15   ;;  %v1528_v25 = vld [vmem:[%s1731_s11] sm:$0xff]   ;;  %v769_v27 = vld [vmem:[%s1737_s14 + $0x48] sm:$0xff]  ;;  %v771_v29 = vld [vmem:[%s1737_s14 + $0x58] sm:$0xff]  ;;  %v1019_v15 = vshrl.u32 %v1018_v12, 7  ;;  %p1551_p1 = scmp.lt.s32.totalorder %s2009_s7, %s1549_s13 }
  0x21   : > { %809 = vperm.xlu1 %1503, %v763_v14   ;;  %v1529_v26 = vld [vmem:[%s1731_s11 + $0x40] sm:$0xff]   ;;  %v770_v30 = vld [vmem:[%s1737_s14 + $0x50] sm:$0xff]  ;;  %v1530_v31 = vld [vmem:[%s1731_s11 + $0x8] sm:$0xff]  }
  0x22   : > { %572 = vmatpush1.bf16.msra.mxu0 %v1512_v6  ;;  %1438 = vmatpush1.bf16.msra.mxu1 %v1512_v6  ;;  %v768_v28 = vld [vmem:[%s1737_s14 + $0x40] sm:$0xff]  ;;  %v1531_v32 = vld [vmem:[%s1731_s11 + $0x48] sm:$0xff]   ;;  %v775_v35 = vld [vmem:[%s1737_s14 + $0x78] sm:$0xff] }
  0x23   : > { %573 = vmatprep.subr.bf16.mxu0 %v1513_v7  ;;  %1431 = vmatprep.subr.bf16.mxu1 %v1513_v7  ;;  %v773_v33 = vld [vmem:[%s1737_s14 + $0x68] sm:$0xff]  ;;  %v772_v34 = vld [vmem:[%s1737_s14 + $0x60] sm:$0xff]  ;;  %v774_v36 = vld [vmem:[%s1737_s14 + $0x70] sm:$0xff] }
  0x24   : > { %814 = vperm.xlu0 %1502, %v764_v19   ;;  %v1532_v37 = vld [vmem:[%s1731_s11 + $0x10] sm:$0xff]   ;;  %v777_v39 = vld [vmem:[%s1737_s14 + $0x88] sm:$0xff]  ;;  %v776_v40 = vld [vmem:[%s1737_s14 + $0x80] sm:$0xff] }
  0x25   : > { %819 = vperm.xlu1 %1503, %v765_v18   ;;  %v1533_v38 = vld [vmem:[%s1731_s11 + $0x50] sm:$0xff]   ;;  %v779_v41 = vld [vmem:[%s1737_s14 + $0x98] sm:$0xff]  ;;  %v781_v45 = vld [vmem:[%s1737_s14 + $0xa8] sm:$0xff]  ;;  %v1020_v18 = vsub.s32 0, %v1019_v15 }
  0x26   : > { %574 = vmatpush1.bf16.msra.mxu0 %v1515_v8  ;;  %1439 = vmatpush1.bf16.msra.mxu1 %v1515_v8  ;;  %v778_v42 = vld [vmem:[%s1737_s14 + $0x90] sm:$0xff]  ;;  %v1534_v43 = vld [vmem:[%s1731_s11 + $0x18] sm:$0xff]   ;;  %v780_v46 = vld [vmem:[%s1737_s14 + $0xa0] sm:$0xff] }
  0x27   : > { %575 = vmatprep.subr.bf16.mxu0 %v1516_v9  ;;  %1432 = vmatprep.subr.bf16.mxu1 %v1516_v9  ;;  %v1535_v44 = vld [vmem:[%s1731_s11 + $0x58] sm:$0xff]   ;;  %v782_v48 = vld [vmem:[%s1737_s14 + $0xb0] sm:$0xff]  ;;  %v1536_v49 = vld [vmem:[%s1731_s11 + $0x20] sm:$0xff]  }
  0x28   : > { %824 = vperm.xlu0 %1502, %v766_v23   ;;  %v783_v47 = vld [vmem:[%s1737_s14 + $0xb8] sm:$0xff]  ;;  %v1537_v50 = vld [vmem:[%s1731_s11 + $0x60] sm:$0xff]   ;;  %v785_v51 = vld [vmem:[%s1737_s14 + $0xc8] sm:$0xff] }
  0x29   : > { %829 = vperm.xlu1 %1503, %v767_v22   ;;  %v784_v52 = vld [vmem:[%s1737_s14 + $0xc0] sm:$0xff]  ;;  %v787_v53 = vld [vmem:[%s1737_s14 + $0xd8] sm:$0xff]  ;;  %v786_v54 = vld [vmem:[%s1737_s14 + $0xd0] sm:$0xff] }
  0x2a   : > { %576 = vmatpush1.bf16.msra.mxu0 %v1518_v10  ;;  %1440 = vmatpush1.bf16.msra.mxu1 %v1518_v10  ;;  %v1538_v55 = vld [vmem:[%s1731_s11 + $0x28] sm:$0xff]   ;;  %v788_v58 = vld [vmem:[%s1737_s14 + $0xe0] sm:$0xff]  ;;  %v791_v59 = vld [vmem:[%s1737_s14 + $0xf8] sm:$0xff] }
  0x2b   : > { %577 = vmatprep.subr.bf16.mxu0 %v1519_v13  ;;  %1433 = vmatprep.subr.bf16.mxu1 %v1519_v13  ;;  %v1539_v56 = vld [vmem:[%s1731_s11 + $0x68] sm:$0xff]   ;;  %v790_v60 = vld [vmem:[%s1737_s14 + $0xf0] sm:$0xff]  ;;  %v1542_v63 = vld [vmem:[%s1731_s11 + $0x38] sm:$0xff]  }
  0x2c   : > { %834 = vperm.xlu0 %1502, %v768_v28   ;;  %v789_v57 = vld [vmem:[%s1737_s14 + $0xe8] sm:$0xff]  ;;  %v1540_v61 = vld [vmem:[%s1731_s11 + $0x30] sm:$0xff]   ;;  %v1543_v1 = vld [vmem:[%s1731_s11 + $0x78] sm:$0xff]   ;;  %s1550_s14 = scalar_lea.vmem %s1549_s13, 16384 }
  0x2d   : > { %839 = vperm.xlu1 %1503, %v769_v27   ;;  %v1541_v62 = vld [vmem:[%s1731_s11 + $0x70] sm:$0xff]   ;;  %v1016_v19 = vld [vmem:[%s338_s26] sm:$0x3]  ;;  %s1544_s11 = scalar_lea.vmem %s2009_s7, 8192 }
  0x2e   : > { %578 = vmatpush1.bf16.msra.mxu0 %v1521_v16  ;;  %1441 = vmatpush1.bf16.msra.mxu1 %v1521_v16  ;;  %p1545_p12 = scmp.ne.s32.totalorder %s2009_s7, %s1544_s11  ;;  %p1552_p2 = scmp.lt.s32.totalorder %s1550_s14, %s1544_s11 }
  0x2f   : > { %579 = vmatprep.subr.bf16.mxu0 %v1522_v17  ;;  %1434 = vmatprep.subr.bf16.mxu1 %v1522_v17 }
  0x30   : > { %844 = vperm.xlu0 %1502, %v770_v30   ;;  %p1546_p13 = pnand %p1545_p12, %p1691_p4  ;;  %p1553_p3 = por %p1552_p2, %p1551_p1 }
  0x31   : > { %849 = vperm.xlu1 %1503, %v771_v29  }
  0x32   : > { %580 = vmatpush1.bf16.msra.mxu0 %v1524_v20  ;;  %1442 = vmatpush1.bf16.msra.mxu1 %v1524_v20  ;;  %v1024_v20 = vsub.s32 1, %v1019_v15  ;;  %p1547_p0 = pneg %p1546_p13 }
  0x33   : > { %581 = vmatprep.subr.bf16.mxu0 %v1525_v21  ;;  %1435 = vmatprep.subr.bf16.mxu1 %v1525_v21  ;;  %v1840_v21 = vrot.slane %v1016_v19, %v1020_v18 }
  0x34   : > { %854 = vperm.xlu0 %1502, %v772_v34   ;;  %p1554_p5 = pnand %p1553_p3, %p1547_p0 }
  0x35   : > { %859 = vperm.xlu1 %1503, %v773_v33  }
  0x36   : > { %582 = vmatpush1.bf16.msra.mxu0 %v1527_v24  ;;  %1443 = vmatpush1.bf16.msra.mxu1 %v1527_v24 }
  0x38   : > { %864 = vperm.xlu0 %1502, %v774_v36  }
  0x39   : > { %600 = vmatmul.mubr.bf16.vlgmr.msra.gmra.mxu0 %v1528_v25  ;;  %680 = vmatmul.mubr.bf16.vlgmr.msra.gmra.mxu1 %v1529_v26  ;;  %v1844_v26 = vrot.slane %v1016_v19, %v1024_v20 }
  0x3a   : > { %609 = vmatprep.mubr.bf16.mxu0 %v1622_v0  ;;  %689 = vmatprep.mubr.bf16.mxu1 %v1622_v0 }
  0x3b   : > { %869 = vperm.xlu1 %1503, %v775_v35  }
  0x3c   : > { %874 = vperm.xlu0 %1502, %v776_v40  }
  0x3f   : > { %879 = vperm.xlu1 %1503, %v777_v39  }
  0x40   : > { %884 = vperm.xlu0 %1502, %v778_v42  }
  0x41   : > { %610 = vmatmul.mubr.bf16.gmra.mxu0 %v1530_v31  ;;  %690 = vmatmul.mubr.bf16.gmra.mxu1 %v1531_v32 }
  0x42   : > { %619 = vmatprep.mubr.bf16.mxu0 %v1622_v0  ;;  %699 = vmatprep.mubr.bf16.mxu1 %v1622_v0 }
  0x43   : > { %889 = vperm.xlu1 %1503, %v779_v41  }
  0x44   : > { %894 = vperm.xlu0 %1502, %v780_v46  }
  0x47   : > { %899 = vperm.xlu1 %1503, %v781_v45  }
  0x48   : > { %904 = vperm.xlu0 %1502, %v782_v48  }
  0x49   : > { %620 = vmatmul.mubr.bf16.gmra.mxu0 %v1532_v37  ;;  %700 = vmatmul.mubr.bf16.gmra.mxu1 %v1533_v38 }
  0x4a   : > { %629 = vmatprep.mubr.bf16.mxu0 %v1622_v0  ;;  %709 = vmatprep.mubr.bf16.mxu1 %v1622_v0 }
  0x4b   : > { %909 = vperm.xlu1 %1503, %v783_v47  }
  0x4c   : > { %914 = vperm.xlu0 %1502, %v784_v52  }
  0x4f   : > { %919 = vperm.xlu1 %1503, %v785_v51  }
  0x50   : > { %924 = vperm.xlu0 %1502, %v786_v54  }
  0x51   : > { %630 = vmatmul.mubr.bf16.gmra.mxu0 %v1534_v43  ;;  %710 = vmatmul.mubr.bf16.gmra.mxu1 %v1535_v44 }
  0x52   : > { %639 = vmatprep.mubr.bf16.mxu0 %v1622_v0  ;;  %719 = vmatprep.mubr.bf16.mxu1 %v1622_v0 }
  0x53   : > { %929 = vperm.xlu1 %1503, %v787_v53  }
  0x54   : > { %934 = vperm.xlu0 %1502, %v788_v58  }
  0x57   : > { %939 = vperm.xlu1 %1503, %v789_v57  }
  0x58   : > { %944 = vperm.xlu0 %1502, %v790_v60  }
  0x59   : > { %640 = vmatmul.mubr.bf16.gmra.mxu0 %v1536_v49  ;;  %720 = vmatmul.mubr.bf16.gmra.mxu1 %v1537_v50 }
  0x5a   : > { %649 = vmatprep.mubr.bf16.mxu0 %v1622_v0  ;;  %729 = vmatprep.mubr.bf16.mxu1 %v1622_v0 }
  0x5b   : > { %949 = vperm.xlu1 %1503, %v791_v59  }
  0x61   : > { %650 = vmatmul.mubr.bf16.gmra.mxu0 %v1538_v55  ;;  %730 = vmatmul.mubr.bf16.gmra.mxu1 %v1539_v56 }
  0x62   : > { %659 = vmatprep.mubr.bf16.mxu0 %v1622_v0  ;;  %739 = vmatprep.mubr.bf16.mxu1 %v1622_v0 }
  0x69   : > { %660 = vmatmul.mubr.bf16.gmra.mxu0 %v1540_v61  ;;  %740 = vmatmul.mubr.bf16.gmra.mxu1 %v1541_v62 }
  0x6a   : > { %669 = vmatprep.mubr.bf16.mxu0 %v1622_v0  ;;  %749 = vmatprep.mubr.bf16.mxu1 %v1622_v0 }
  0x71   : > { %670 = vmatmul.mubr.bf16.gmra.mxu0 %v1542_v63  ;;  %750 = vmatmul.mubr.bf16.gmra.mxu1 %v1543_v1 }
  0x97   : > { %v795_v2 = vpop.permute.xlu0 %794 }
  0x98   : > { %v1809_v3 = vpop.permute.xlu1 %804 }
  0x9b   : > { %v800_v4 = vpop.permute.xlu0 %799 }
  0x9c   : > { %v1811_v5 = vpop.permute.xlu1 %809 }
  0x9f   : > { %v1813_v6 = vpop.permute.xlu0 %814 }
  0xa0   : > { %v1815_v7 = vpop.permute.xlu1 %819 }
  0xa3   : > { %v1817_v8 = vpop.permute.xlu0 %824 }
  0xa4   : > { %v1819_v9 = vpop.permute.xlu1 %829 }
  0xa7   : > { %v1821_v0 = vpop.permute.xlu0 %834 }
  0xa8   : > { %v1823_v10 = vpop.permute.xlu1 %839 }
  0xab   : > { %v1825_v11 = vpop.permute.xlu0 %844 }
  0xac   : > { %v1827_v13 = vpop.permute.xlu1 %849 }
  0xaf   : > { %v1829_v14 = vpop.permute.xlu0 %854 }
  0xb0   : > { %v1835_v16 = vpop.permute.xlu1 %859 }
  0xb3   : > { %v1837_v17 = vpop.permute.xlu0 %864 }
  0xb6   : > { %v1842_v22 = vpop.permute.xlu1 %869 }
  0xb7   : > { %v875_v23 = vpop.permute.xlu0 %874 }
  0xba   : > { %v880_v37 = vpop.permute.xlu1 %879 }
  0xbb   : > { %v885_v46 = vpop.permute.xlu0 %884 }
  0xbe   : > { %v890_v63 = vpop.permute.xlu1 %889 }
  0xf9   : > { %v601_v24 = vpop.f32.mrf.mxu0  ;;  %v681_v25 = vpop.f32.mrf.mxu1 }
  0xfa   : > { %v952_v27 = vmul.f32 %v795_v2, %v601_v24  ;;  %v984_v28 = vmul.f32 %v875_v23, %v681_v25 }
  0xfb   : > { %v603_v29 = vpop.f32.mrf.mxu0  ;;  %v683_v30 = vpop.f32.mrf.mxu1 }
  0xfc   : > { %v1028_v31 = vmul.f32 %v1840_v21, %v952_v27  ;;  %v1060_v32 = vmul.f32 %v1840_v21, %v984_v28  ;;  %v953_v33 = vmul.f32 %v795_v2, %v603_v29  ;;  %v985_v34 = vmul.f32 %v875_v23, %v683_v30 }
  0xfd   : > { %v605_v35 = vpop.f32.mrf.mxu0  ;;  %v685_v36 = vpop.f32.mrf.mxu1 }
  0xfe   : > { %v1092_v38 = vmax.f32 %v1028_v31, 0.0  ;;  %v1124_v39 = vmax.f32 %v1060_v32, 0.0  ;;  %v1029_v40 = vmul.f32 %v1844_v26, %v953_v33  ;;  %v1061_v41 = vmul.f32 %v1844_v26, %v985_v34 }
  0xff   : > { %v954_v42 = vmul.f32 %v800_v4, %v605_v35  ;;  %v986_v43 = vmul.f32 %v880_v37, %v685_v36  ;;  %v607_v44 = vpop.f32.mrf.mxu0  ;;  %v687_v45 = vpop.f32.mrf.mxu1 }
 0x100   : > { %1156 = vst [vmem:[%s1852_s5] sm:$0xff] %v1092_v38  ;;  %1188 = vst [vmem:[%s1852_s5 + $0x100] sm:$0xff] %v1124_v39  ;;  %v1093_v47 = vmax.f32 %v1029_v40, 0.0  ;;  %v1125_v48 = vmax.f32 %v1061_v41, 0.0  ;;  %v955_v49 = vmul.f32 %v800_v4, %v607_v44  ;;  %v987_v50 = vmul.f32 %v880_v37, %v687_v45  ;;  %v895_v39 = vpop.permute.xlu0 %894 }
 0x101   : > { %v1030_v51 = vmul.f32 %v1840_v21, %v954_v42  ;;  %v1062_v52 = vmul.f32 %v1840_v21, %v986_v43  ;;  %v611_v53 = vpop.f32.mrf.mxu0  ;;  %v691_v54 = vpop.f32.mrf.mxu1 }
 0x102   : > { %1157 = vst [vmem:[%s1852_s5 + $0x8] sm:$0xff] %v1093_v47  ;;  %1189 = vst [vmem:[%s1852_s5 + $0x108] sm:$0xff] %v1125_v48  ;;  %v1031_v55 = vmul.f32 %v1844_v26, %v955_v49  ;;  %v1063_v56 = vmul.f32 %v1844_v26, %v987_v50  ;;  %v956_v57 = vmul.f32 %v1809_v3, %v611_v53  ;;  %v900_v47 = vpop.permute.xlu1 %899 }
 0x103   : > { %v988_v58 = vmul.f32 %v885_v46, %v691_v54  ;;  %v1094_v59 = vmax.f32 %v1030_v51, 0.0  ;;  %v1126_v60 = vmax.f32 %v1062_v52, 0.0  ;;  %v613_v61 = vpop.f32.mrf.mxu0  ;;  %v693_v62 = vpop.f32.mrf.mxu1 }
 0x104   : > { %v1095_v1 = vmax.f32 %v1031_v55, 0.0  ;;  %v1127_v2 = vmax.f32 %v1063_v56, 0.0  ;;  %v1032_v4 = vmul.f32 %v1840_v21, %v956_v57  ;;  %v957_v15 = vmul.f32 %v1809_v3, %v613_v61 }
 0x105   : > { %v1064_v12 = vmul.f32 %v1840_v21, %v988_v58  ;;  %1158 = vst [vmem:[%s1852_s5 + $0x10] sm:$0xff] %v1094_v59  ;;  %1190 = vst [vmem:[%s1852_s5 + $0x110] sm:$0xff] %v1126_v60  ;;  %v989_v18 = vmul.f32 %v885_v46, %v693_v62  ;;  %v615_v19 = vpop.f32.mrf.mxu0  ;;  %v695_v20 = vpop.f32.mrf.mxu1 }
 0x106   : > { %1159 = vst [vmem:[%s1852_s5 + $0x18] sm:$0xff] %v1095_v1  ;;  %1191 = vst [vmem:[%s1852_s5 + $0x118] sm:$0xff] %v1127_v2  ;;  %v1096_v23 = vmax.f32 %v1032_v4, 0.0  ;;  %v958_v25 = vmul.f32 %v1811_v5, %v615_v19  ;;  %v990_v27 = vmul.f32 %v890_v63, %v695_v20  ;;  %v1033_v28 = vmul.f32 %v1844_v26, %v957_v15 }
 0x107   : > { %v1128_v24 = vmax.f32 %v1064_v12, 0.0  ;;  %v1065_v29 = vmul.f32 %v1844_v26, %v989_v18  ;;  %v617_v30 = vpop.f32.mrf.mxu0  ;;  %v697_v31 = vpop.f32.mrf.mxu1 }
 0x108   : > { %1160 = vst [vmem:[%s1852_s5 + $0x20] sm:$0xff] %v1096_v23  ;;  %v1034_v3 = vmul.f32 %v1840_v21, %v958_v25  ;;  %v1066_v32 = vmul.f32 %v1840_v21, %v990_v27  ;;  %v959_v33 = vmul.f32 %v1811_v5, %v617_v30  ;;  %v991_v34 = vmul.f32 %v890_v63, %v697_v31  ;;  %v905_v63 = vpop.permute.xlu0 %904 }
 0x109   : > { %1192 = vst [vmem:[%s1852_s5 + $0x120] sm:$0xff] %v1128_v24  ;;  %v1097_v35 = vmax.f32 %v1033_v28, 0.0  ;;  %v1129_v36 = vmax.f32 %v1065_v29, 0.0  ;;  %v621_v37 = vpop.f32.mrf.mxu0  ;;  %v701_v38 = vpop.f32.mrf.mxu1 }
 0x10a   : > { %v1098_v40 = vmax.f32 %v1034_v3, 0.0  ;;  %v1130_v41 = vmax.f32 %v1066_v32, 0.0  ;;  %v1035_v42 = vmul.f32 %v1844_v26, %v959_v33  ;;  %v1067_v43 = vmul.f32 %v1844_v26, %v991_v34 }
 0x10b   : > { %1161 = vst [vmem:[%s1852_s5 + $0x28] sm:$0xff] %v1097_v35  ;;  %1193 = vst [vmem:[%s1852_s5 + $0x128] sm:$0xff] %v1129_v36  ;;  %v960_v44 = vmul.f32 %v1813_v6, %v621_v37  ;;  %v992_v5 = vmul.f32 %v895_v39, %v701_v38  ;;  %v623_v45 = vpop.f32.mrf.mxu0  ;;  %v703_v46 = vpop.f32.mrf.mxu1 }
 0x10c   : > { %1162 = vst [vmem:[%s1852_s5 + $0x30] sm:$0xff] %v1098_v40  ;;  %1194 = vst [vmem:[%s1852_s5 + $0x130] sm:$0xff] %v1130_v41  ;;  %v1099_v48 = vmax.f32 %v1035_v42, 0.0  ;;  %v1131_v49 = vmax.f32 %v1067_v43, 0.0  ;;  %v961_v50 = vmul.f32 %v1813_v6, %v623_v45  ;;  %v993_v51 = vmul.f32 %v895_v39, %v703_v46  ;;  %v910_v38 = vpop.permute.xlu1 %909  ;;  %v915_v45 = vpop.permute.xlu0 %914 }
 0x10d   : > { %v1036_v52 = vmul.f32 %v1840_v21, %v960_v44  ;;  %v1068_v53 = vmul.f32 %v1840_v21, %v992_v5  ;;  %v625_v54 = vpop.f32.mrf.mxu0  ;;  %v705_v55 = vpop.f32.mrf.mxu1 }
 0x10e   : > { %1163 = vst [vmem:[%s1852_s5 + $0x38] sm:$0xff] %v1099_v48  ;;  %1195 = vst [vmem:[%s1852_s5 + $0x138] sm:$0xff] %v1131_v49  ;;  %v1037_v56 = vmul.f32 %v1844_v26, %v961_v50  ;;  %v1069_v57 = vmul.f32 %v1844_v26, %v993_v51  ;;  %v962_v58 = vmul.f32 %v1815_v7, %v625_v54 }
 0x10f   : > { %v994_v59 = vmul.f32 %v900_v47, %v705_v55  ;;  %v1100_v6 = vmax.f32 %v1036_v52, 0.0  ;;  %v1132_v60 = vmax.f32 %v1068_v53, 0.0  ;;  %v627_v61 = vpop.f32.mrf.mxu0  ;;  %v707_v62 = vpop.f32.mrf.mxu1 }
 0x110   : > { %v1101_v1 = vmax.f32 %v1037_v56, 0.0  ;;  %v1133_v2 = vmax.f32 %v1069_v57, 0.0  ;;  %v1038_v4 = vmul.f32 %v1840_v21, %v962_v58  ;;  %v963_v15 = vmul.f32 %v1815_v7, %v627_v61 }
 0x111   : > { %v1070_v12 = vmul.f32 %v1840_v21, %v994_v59  ;;  %1164 = vst [vmem:[%s1852_s5 + $0x40] sm:$0xff] %v1100_v6  ;;  %1196 = vst [vmem:[%s1852_s5 + $0x140] sm:$0xff] %v1132_v60  ;;  %v995_v18 = vmul.f32 %v900_v47, %v707_v62  ;;  %v631_v19 = vpop.f32.mrf.mxu0  ;;  %v711_v20 = vpop.f32.mrf.mxu1 }
 0x112   : > { %1165 = vst [vmem:[%s1852_s5 + $0x48] sm:$0xff] %v1101_v1  ;;  %1197 = vst [vmem:[%s1852_s5 + $0x148] sm:$0xff] %v1133_v2  ;;  %v1102_v23 = vmax.f32 %v1038_v4, 0.0  ;;  %v964_v25 = vmul.f32 %v1817_v8, %v631_v19  ;;  %v996_v27 = vmul.f32 %v905_v63, %v711_v20  ;;  %v1039_v28 = vmul.f32 %v1844_v26, %v963_v15  ;;  %v920_v60 = vpop.permute.xlu1 %919 }
 0x113   : > { %v1134_v24 = vmax.f32 %v1070_v12, 0.0  ;;  %v1071_v29 = vmul.f32 %v1844_v26, %v995_v18  ;;  %v633_v30 = vpop.f32.mrf.mxu0  ;;  %v713_v31 = vpop.f32.mrf.mxu1 }
 0x114   : > { %1166 = vst [vmem:[%s1852_s5 + $0x50] sm:$0xff] %v1102_v23  ;;  %v1040_v7 = vmul.f32 %v1840_v21, %v964_v25  ;;  %v1072_v3 = vmul.f32 %v1840_v21, %v996_v27  ;;  %v965_v32 = vmul.f32 %v1817_v8, %v633_v30  ;;  %v997_v33 = vmul.f32 %v905_v63, %v713_v31 }
 0x115   : > { %1198 = vst [vmem:[%s1852_s5 + $0x150] sm:$0xff] %v1134_v24  ;;  %v1103_v34 = vmax.f32 %v1039_v28, 0.0  ;;  %v1135_v35 = vmax.f32 %v1071_v29, 0.0  ;;  %v635_v36 = vpop.f32.mrf.mxu0  ;;  %v715_v37 = vpop.f32.mrf.mxu1 }
 0x116   : > { %v1104_v39 = vmax.f32 %v1040_v7, 0.0  ;;  %v1136_v40 = vmax.f32 %v1072_v3, 0.0  ;;  %v1041_v41 = vmul.f32 %v1844_v26, %v965_v32  ;;  %v1073_v42 = vmul.f32 %v1844_v26, %v997_v33 }
 0x117   : > { %1167 = vst [vmem:[%s1852_s5 + $0x58] sm:$0xff] %v1103_v34  ;;  %1199 = vst [vmem:[%s1852_s5 + $0x158] sm:$0xff] %v1135_v35  ;;  %v966_v43 = vmul.f32 %v1819_v9, %v635_v36  ;;  %v998_v8 = vmul.f32 %v910_v38, %v715_v37  ;;  %v637_v44 = vpop.f32.mrf.mxu0  ;;  %v717_v5 = vpop.f32.mrf.mxu1 }
 0x118   : > { %1168 = vst [vmem:[%s1852_s5 + $0x60] sm:$0xff] %v1104_v39  ;;  %1200 = vst [vmem:[%s1852_s5 + $0x160] sm:$0xff] %v1136_v40  ;;  %v1105_v46 = vmax.f32 %v1041_v41, 0.0  ;;  %v1137_v47 = vmax.f32 %v1073_v42, 0.0  ;;  %v967_v48 = vmul.f32 %v1819_v9, %v637_v44  ;;  %v999_v49 = vmul.f32 %v910_v38, %v717_v5  ;;  %v925_v34 = vpop.permute.xlu0 %924  ;;  %v930_v42 = vpop.permute.xlu1 %929 }
 0x119   : > { %v1042_v50 = vmul.f32 %v1840_v21, %v966_v43  ;;  %v1074_v51 = vmul.f32 %v1840_v21, %v998_v8  ;;  %v641_v52 = vpop.f32.mrf.mxu0  ;;  %v721_v53 = vpop.f32.mrf.mxu1 }
 0x11a   : > { %1169 = vst [vmem:[%s1852_s5 + $0x68] sm:$0xff] %v1105_v46  ;;  %1201 = vst [vmem:[%s1852_s5 + $0x168] sm:$0xff] %v1137_v47  ;;  %v1043_v54 = vmul.f32 %v1844_v26, %v967_v48  ;;  %v1075_v55 = vmul.f32 %v1844_v26, %v999_v49  ;;  %v968_v56 = vmul.f32 %v1821_v0, %v641_v52 }
 0x11b   : > { %v1000_v57 = vmul.f32 %v915_v45, %v721_v53  ;;  %v1106_v9 = vmax.f32 %v1042_v50, 0.0  ;;  %v1138_v58 = vmax.f32 %v1074_v51, 0.0  ;;  %v643_v59 = vpop.f32.mrf.mxu0  ;;  %v723_v6 = vpop.f32.mrf.mxu1 }
 0x11c   : > { %v1107_v61 = vmax.f32 %v1043_v54, 0.0  ;;  %v1139_v62 = vmax.f32 %v1075_v55, 0.0  ;;  %v1044_v63 = vmul.f32 %v1840_v21, %v968_v56  ;;  %v969_v2 = vmul.f32 %v1821_v0, %v643_v59  ;;  %v935_v56 = vpop.permute.xlu0 %934 }
 0x11d   : > { %v1076_v1 = vmul.f32 %v1840_v21, %v1000_v57  ;;  %1170 = vst [vmem:[%s1852_s5 + $0x70] sm:$0xff] %v1106_v9  ;;  %1202 = vst [vmem:[%s1852_s5 + $0x170] sm:$0xff] %v1138_v58  ;;  %v1001_v4 = vmul.f32 %v915_v45, %v723_v6  ;;  %v645_v12 = vpop.f32.mrf.mxu0  ;;  %v725_v15 = vpop.f32.mrf.mxu1 }
 0x11e   : > { %1171 = vst [vmem:[%s1852_s5 + $0x78] sm:$0xff] %v1107_v61  ;;  %1203 = vst [vmem:[%s1852_s5 + $0x178] sm:$0xff] %v1139_v62  ;;  %v1108_v18 = vmax.f32 %v1044_v63, 0.0  ;;  %v970_v20 = vmul.f32 %v1823_v10, %v645_v12  ;;  %v1002_v23 = vmul.f32 %v920_v60, %v725_v15  ;;  %v1045_v24 = vmul.f32 %v1844_v26, %v969_v2 }
 0x11f   : > { %v1140_v19 = vmax.f32 %v1076_v1, 0.0  ;;  %v1077_v25 = vmul.f32 %v1844_v26, %v1001_v4  ;;  %v647_v27 = vpop.f32.mrf.mxu0  ;;  %v727_v28 = vpop.f32.mrf.mxu1 }
 0x120   : > { %1172 = vst [vmem:[%s1852_s5 + $0x80] sm:$0xff] %v1108_v18  ;;  %v1046_v0 = vmul.f32 %v1840_v21, %v970_v20  ;;  %v1078_v29 = vmul.f32 %v1840_v21, %v1002_v23  ;;  %v971_v30 = vmul.f32 %v1823_v10, %v647_v27  ;;  %v1003_v31 = vmul.f32 %v920_v60, %v727_v28 }
 0x121   : > { %1204 = vst [vmem:[%s1852_s5 + $0x180] sm:$0xff] %v1140_v19  ;;  %v1109_v7 = vmax.f32 %v1045_v24, 0.0  ;;  %v1141_v3 = vmax.f32 %v1077_v25, 0.0  ;;  %v651_v32 = vpop.f32.mrf.mxu0  ;;  %v731_v33 = vpop.f32.mrf.mxu1 }
 0x122   : > { %v1110_v35 = vmax.f32 %v1046_v0, 0.0  ;;  %v1142_v36 = vmax.f32 %v1078_v29, 0.0  ;;  %v1047_v37 = vmul.f32 %v1844_v26, %v971_v30  ;;  %v1079_v38 = vmul.f32 %v1844_v26, %v1003_v31  ;;  %v940_v29 = vpop.permute.xlu1 %939 }
 0x123   : > { %1173 = vst [vmem:[%s1852_s5 + $0x88] sm:$0xff] %v1109_v7  ;;  %1205 = vst [vmem:[%s1852_s5 + $0x188] sm:$0xff] %v1141_v3  ;;  %v972_v39 = vmul.f32 %v1825_v11, %v651_v32  ;;  %v1004_v10 = vmul.f32 %v925_v34, %v731_v33  ;;  %v653_v40 = vpop.f32.mrf.mxu0  ;;  %v733_v41 = vpop.f32.mrf.mxu1 }
 0x124   : > { %1174 = vst [vmem:[%s1852_s5 + $0x90] sm:$0xff] %v1110_v35  ;;  %1206 = vst [vmem:[%s1852_s5 + $0x190] sm:$0xff] %v1142_v36  ;;  %v1111_v43 = vmax.f32 %v1047_v37, 0.0  ;;  %v1143_v8 = vmax.f32 %v1079_v38, 0.0  ;;  %v973_v44 = vmul.f32 %v1825_v11, %v653_v40  ;;  %v1005_v5 = vmul.f32 %v925_v34, %v733_v41  ;;  %v945_v35 = vpop.permute.xlu0 %944 }
 0x125   : > { %v1048_v45 = vmul.f32 %v1840_v21, %v972_v39  ;;  %v1080_v46 = vmul.f32 %v1840_v21, %v1004_v10  ;;  %v655_v47 = vpop.f32.mrf.mxu0  ;;  %v735_v48 = vpop.f32.mrf.mxu1 }
 0x126   : > { %1175 = vst [vmem:[%s1852_s5 + $0x98] sm:$0xff] %v1111_v43  ;;  %1207 = vst [vmem:[%s1852_s5 + $0x198] sm:$0xff] %v1143_v8  ;;  %v1049_v49 = vmul.f32 %v1844_v26, %v973_v44  ;;  %v1081_v50 = vmul.f32 %v1844_v26, %v1005_v5  ;;  %v974_v51 = vmul.f32 %v1827_v13, %v655_v47 }
 0x127   : > { %v1006_v52 = vmul.f32 %v930_v42, %v735_v48  ;;  %v1112_v11 = vmax.f32 %v1048_v45, 0.0  ;;  %v1144_v53 = vmax.f32 %v1080_v46, 0.0  ;;  %v657_v54 = vpop.f32.mrf.mxu0  ;;  %v737_v55 = vpop.f32.mrf.mxu1 }
 0x128   : > { %v1113_v57 = vmax.f32 %v1049_v49, 0.0  ;;  %v1145_v9 = vmax.f32 %v1081_v50, 0.0  ;;  %v1050_v58 = vmul.f32 %v1840_v21, %v974_v51  ;;  %v975_v6 = vmul.f32 %v1827_v13, %v657_v54  ;;  %v950_v48 = vpop.permute.xlu1 %949 }
 0x129   : > { %v1082_v59 = vmul.f32 %v1840_v21, %v1006_v52  ;;  %1176 = vst [vmem:[%s1852_s5 + $0xa0] sm:$0xff] %v1112_v11  ;;  %1208 = vst [vmem:[%s1852_s5 + $0x1a0] sm:$0xff] %v1144_v53  ;;  %v1007_v60 = vmul.f32 %v930_v42, %v737_v55  ;;  %v661_v61 = vpop.f32.mrf.mxu0  ;;  %v741_v62 = vpop.f32.mrf.mxu1 }
 0x12a   : > { %1177 = vst [vmem:[%s1852_s5 + $0xa8] sm:$0xff] %v1113_v57  ;;  %1209 = vst [vmem:[%s1852_s5 + $0x1a8] sm:$0xff] %v1145_v9  ;;  %v1114_v63 = vmax.f32 %v1050_v58, 0.0  ;;  %v976_v2 = vmul.f32 %v1829_v14, %v661_v61  ;;  %v1008_v4 = vmul.f32 %v935_v56, %v741_v62  ;;  %v1051_v12 = vmul.f32 %v1844_v26, %v975_v6 }
 0x12b   : > { %v1146_v1 = vmax.f32 %v1082_v59, 0.0  ;;  %v1083_v15 = vmul.f32 %v1844_v26, %v1007_v60  ;;  %v663_v18 = vpop.f32.mrf.mxu0  ;;  %v743_v19 = vpop.f32.mrf.mxu1 }
 0x12c   : > { %1178 = vst [vmem:[%s1852_s5 + $0xb0] sm:$0xff] %v1114_v63  ;;  %v1052_v13 = vmul.f32 %v1840_v21, %v976_v2  ;;  %v1084_v20 = vmul.f32 %v1840_v21, %v1008_v4  ;;  %v977_v23 = vmul.f32 %v1829_v14, %v663_v18  ;;  %v1009_v24 = vmul.f32 %v935_v56, %v743_v19 }
 0x12d   : > { %1210 = vst [vmem:[%s1852_s5 + $0x1b0] sm:$0xff] %v1146_v1  ;;  %v1115_v25 = vmax.f32 %v1051_v12, 0.0  ;;  %v1147_v27 = vmax.f32 %v1083_v15, 0.0  ;;  %v665_v28 = vpop.f32.mrf.mxu0  ;;  %v745_v0 = vpop.f32.mrf.mxu1 }
 0x12e   : > { %v1116_v30 = vmax.f32 %v1052_v13, 0.0  ;;  %v1148_v31 = vmax.f32 %v1084_v20, 0.0  ;;  %v1053_v7 = vmul.f32 %v1844_v26, %v977_v23  ;;  %v1085_v3 = vmul.f32 %v1844_v26, %v1009_v24 }
 0x12f   : > { %1179 = vst [vmem:[%s1852_s5 + $0xb8] sm:$0xff] %v1115_v25  ;;  %1211 = vst [vmem:[%s1852_s5 + $0x1b8] sm:$0xff] %v1147_v27  ;;  %v978_v32 = vmul.f32 %v1835_v16, %v665_v28  ;;  %v1010_v14 = vmul.f32 %v940_v29, %v745_v0  ;;  %v667_v33 = vpop.f32.mrf.mxu0  ;;  %v747_v34 = vpop.f32.mrf.mxu1 }
 0x130   : > { %1180 = vst [vmem:[%s1852_s5 + $0xc0] sm:$0xff] %v1116_v30  ;;  %1212 = vst [vmem:[%s1852_s5 + $0x1c0] sm:$0xff] %v1148_v31  ;;  %v1117_v36 = vmax.f32 %v1053_v7, 0.0  ;;  %v1149_v37 = vmax.f32 %v1085_v3, 0.0  ;;  %v979_v38 = vmul.f32 %v1835_v16, %v667_v33  ;;  %v1011_v39 = vmul.f32 %v940_v29, %v747_v34 }
 0x131   : > { %v1054_v10 = vmul.f32 %v1840_v21, %v978_v32  ;;  %v1086_v40 = vmul.f32 %v1840_v21, %v1010_v14  ;;  %v671_v41 = vpop.f32.mrf.mxu0  ;;  %v751_v42 = vpop.f32.mrf.mxu1 }
 0x132   : > { %1181 = vst [vmem:[%s1852_s5 + $0xc8] sm:$0xff] %v1117_v36  ;;  %1213 = vst [vmem:[%s1852_s5 + $0x1c8] sm:$0xff] %v1149_v37  ;;  %v1055_v43 = vmul.f32 %v1844_v26, %v979_v38  ;;  %v1087_v8 = vmul.f32 %v1844_v26, %v1011_v39  ;;  %v980_v44 = vmul.f32 %v1837_v17, %v671_v41 }
 0x133   : > { %v1012_v5 = vmul.f32 %v945_v35, %v751_v42  ;;  %v1118_v16 = vmax.f32 %v1054_v10, 0.0  ;;  %v1150_v45 = vmax.f32 %v1086_v40, 0.0  ;;  %v673_v46 = vpop.f32.mrf.mxu0  ;;  %v753_v47 = vpop.f32.mrf.mxu1 }
 0x134   : > { %v1119_v49 = vmax.f32 %v1055_v43, 0.0  ;;  %v1151_v50 = vmax.f32 %v1087_v8, 0.0  ;;  %v1056_v51 = vmul.f32 %v1840_v21, %v980_v44  ;;  %v981_v11 = vmul.f32 %v1837_v17, %v673_v46 }
 0x135   : > { %v1088_v52 = vmul.f32 %v1840_v21, %v1012_v5  ;;  %1182 = vst [vmem:[%s1852_s5 + $0xd0] sm:$0xff] %v1118_v16  ;;  %1214 = vst [vmem:[%s1852_s5 + $0x1d0] sm:$0xff] %v1150_v45  ;;  %v1013_v53 = vmul.f32 %v945_v35, %v753_v47  ;;  %v675_v54 = vpop.f32.mrf.mxu0  ;;  %v755_v55 = vpop.f32.mrf.mxu1 }
 0x136   : > { %1183 = vst [vmem:[%s1852_s5 + $0xd8] sm:$0xff] %v1119_v49  ;;  %1215 = vst [vmem:[%s1852_s5 + $0x1d8] sm:$0xff] %v1151_v50  ;;  %v1120_v56 = vmax.f32 %v1056_v51, 0.0  ;;  %v982_v9 = vmul.f32 %v1842_v22, %v675_v54  ;;  %v1014_v58 = vmul.f32 %v950_v48, %v755_v55  ;;  %v1057_v59 = vmul.f32 %v1844_v26, %v981_v11 }
 0x137   : > { %v1152_v57 = vmax.f32 %v1088_v52, 0.0  ;;  %v1089_v6 = vmul.f32 %v1844_v26, %v1013_v53  ;;  %v677_v60 = vpop.f32.mrf.mxu0  ;;  %v757_v61 = vpop.f32.mrf.mxu1 }
 0x138   : > { %1184 = vst [vmem:[%s1852_s5 + $0xe0] sm:$0xff] %v1120_v56  ;;  %v1058_v17 = vmul.f32 %v1840_v21, %v982_v9  ;;  %v1090_v62 = vmul.f32 %v1840_v21, %v1014_v58  ;;  %v983_v63 = vmul.f32 %v1842_v22, %v677_v60  ;;  %v1015_v1 = vmul.f32 %v950_v48, %v757_v61 }
 0x139   : > { %1216 = vst [vmem:[%s1852_s5 + $0x1e0] sm:$0xff] %v1152_v57  ;;  %v1121_v2 = vmax.f32 %v1057_v59, 0.0  ;;  %v1153_v4 = vmax.f32 %v1089_v6, 0.0 }
 0x13a   : > { %v1122_v12 = vmax.f32 %v1058_v17, 0.0  ;;  %v1154_v15 = vmax.f32 %v1090_v62, 0.0  ;;  %v1059_v18 = vmul.f32 %v1844_v26, %v983_v63  ;;  %v1091_v19 = vmul.f32 %v1844_v26, %v1015_v1 }
 0x13b   : > { %1185 = vst [vmem:[%s1852_s5 + $0xe8] sm:$0xff] %v1121_v2  ;;  %1217 = vst [vmem:[%s1852_s5 + $0x1e8] sm:$0xff] %v1153_v4 }
 0x13c   : > { %1186 = vst [vmem:[%s1852_s5 + $0xf0] sm:$0xff] %v1122_v12  ;;  %1218 = vst [vmem:[%s1852_s5 + $0x1f0] sm:$0xff] %v1154_v15  ;;  %v1123_v21 = vmax.f32 %v1059_v18, 0.0  ;;  %v1155_v22 = vmax.f32 %v1091_v19, 0.0 }
 0x13e   : > { %1187 = vst [vmem:[%s1852_s5 + $0xf8] sm:$0xff] %v1123_v21  ;;  %1219 = vst [vmem:[%s1852_s5 + $0x1f8] sm:$0xff] %v1155_v22 }
 0x13f   : > { %1557 = shalt.err (!%p1554_p5)
}
 0x140   : > { %s1558_s21 = scalar_lea.hbm %s2007_s10, 8192  ;;  %s1562_s26 = scalar_lea.hbm %s2066_s4, 16384 }
 0x141   : > { %p1559_p6 = scmp.ne.s32.totalorder %s2007_s10, %s1558_s21  ;;  %p1563_p10 = scmp.lt.s32.totalorder %s2007_s10, %s2066_s4 }
 0x142   : > { %p1564_p11 = scmp.lt.s32.totalorder %s1562_s26, %s1558_s21 }
 0x143   : > { %p1560_p7 = pnand %p1559_p6, %p1691_p4 }
 0x144   : > { %p1565_p12 = por %p1564_p11, %p1563_p10 }
 0x145   : > { %p1561_p9 = pneg %p1560_p7 }
 0x147   : > { %p1566_p13 = pnand %p1565_p12, %p1561_p9 }
 0x149   : > { %1569 = shalt.err (!%p1566_p13)
}
 0x14a   : > { %s1624_s5 = smov 256   ;;  %s1625_s6 = smov 16  }
 0x14b   : > { %1444 = dma.vmem_to_hbm [thread:$0]  (%p1691_p4), %s2009_s7, 8192, %s2007_s10, %s2017_s18, %s1624_s5, %s1624_s5, %s1625_s6  }
 0x14c PF: > { %p1450_p0 = scmp.ge.s32.totalorder %s1620_s20, 2  ;;  %s1254_s8 = sand.u32 1, %s1600_s15  }
 0x14d   : > { %s1255_s9 = scalar_lea.sflag [#allocation3], %s1254_s8 }
 0x14e   : > { %p1447_p1 = pnand %p1450_p0, %p1698_p8 }
 0x150   : > { %p1448_p2 = pneg %p1447_p1 }
 0x152   : > { %1595 = dma.done.wait (%p1448_p2), %s1255_s9, 8192  }
 0x153   : > { %1597 = vsyncadd (%p1448_p2), %s1255_s9, 4294959104  ;;  %s17_s20 = sadd.s32 1, %s1620_s20   ;;  %s2069_s15 = smov %s1604_s16 }
 0x154   : > { %p14_p3 = scmp.ge.s32.totalorder %s17_s20, 4   ;;  %s2070_s16 = smov %s1608_s17 }
 0x155   : > { %s2071_s17 = smov %s1704_s28  ;;  %s2072_s18 = smov %s1616_s19 }
 0x156   : > { %s2073_s19 = smov %s2075_s23  ;;  %16 = sbr.rel (!%p14_p3) target bundleno = 4 (0x4), region = 80 }
 0x15b   :  { %1260 = vsyncpa [#allocation3], 1 }
 0x15c   :  { %1262 = vsyncpa [#allocation3 + $0x1], 1 }

</bundles_post_ra>
